<compile_context>
chip_gen: v5e
topology: v5e:2x2
jax: 0.10.0
libtpu: 0.0.40
codegen_flags: <defaults>
</compile_context>

<pallas_src>
import math

import jax
import jax.numpy as jnp
from jax.experimental import pallas as pl
from jax.experimental.pallas import tpu as pltpu

_LANES = 128
# ~8 MiB per tile: 4 live buffers (in+out, double-buffered) = 32 MiB, which
# fits v7x's 64 MiB physical VMEM with headroom and is tiny on v5e/v6e.
_TARGET_TILE_BYTES = 8 << 20
_VMEM_LIMIT_BYTES = 48 << 20


def _copy_kernel(x_ref, o_ref):
    # Identity copy of one lane-dense (block_rows, 128) tile; this IS the
    # whole forward pass once the metadata reshape has been applied.
    o_ref[...] = x_ref[...]


def _sublanes_for(itemsize):
    """Sublane granularity per dtype width: 8 (4B), 16 (2B), 32 (1B)."""
    return max(8, 32 // int(itemsize))


def _pick_block_rows(rows, sublanes, itemsize):
    """Fixed-target block rows (multiple of `sublanes`), clamped so the grid
    has >= 4 steps.  Returns 0 when the whole array should be a single block."""
    cap = (_TARGET_TILE_BYTES // (_LANES * itemsize)) // sublanes * sublanes
    cap = max(cap, sublanes)
    quarter = (rows // 4) // sublanes * sublanes
    if quarter < sublanes:
        return 0
    return min(cap, quarter)


def _copy_2d(x2d, logical_total):
    """HBM-roofline identity copy of a (rows, 128) slab via Pallas."""
    rows, lanes = x2d.shape
    itemsize = jnp.dtype(x2d.dtype).itemsize
    sublanes = _sublanes_for(itemsize)
    cost = pl.CostEstimate(flops=0, transcendentals=0,
                           bytes_accessed=2 * logical_total * itemsize)

    block_rows = _pick_block_rows(rows, sublanes, itemsize)
    if block_rows == 0:
        # Tiny input: one full-array block (block shape == array shape, so the
        # (8,128) rule is satisfied regardless of `rows`).
        return pl.pallas_call(
            _copy_kernel,
            out_shape=jax.ShapeDtypeStruct((rows, lanes), x2d.dtype),
            in_specs=[pl.BlockSpec((rows, lanes), lambda: (0, 0))],
            out_specs=pl.BlockSpec((rows, lanes), lambda: (0, 0)),
            compiler_params=pltpu.CompilerParams(
                vmem_limit_bytes=_VMEM_LIMIT_BYTES),
            cost_estimate=cost,
        )(x2d)

    # cdiv grid: the trailing partial block (if any) is masked by Pallas, so
    # no divisor search is needed and tiles stay at the target size.
    grid = (pl.cdiv(rows, block_rows),)
    return pl.pallas_call(
        _copy_kernel,
        out_shape=jax.ShapeDtypeStruct((rows, lanes), x2d.dtype),
        grid=grid,
        in_specs=[pl.BlockSpec((block_rows, lanes), lambda i: (i, 0))],
        out_specs=pl.BlockSpec((block_rows, lanes), lambda i: (i, 0)),
        compiler_params=pltpu.CompilerParams(
            dimension_semantics=("parallel",),
            vmem_limit_bytes=_VMEM_LIMIT_BYTES),
        cost_estimate=cost,
    )(x2d)


def flatten_layer(x):
    """Pallas equivalent of FlattenLayer.forward: x.view(x.shape[0], -1)."""
    n = x.shape[0]
    f = int(math.prod(x.shape[1:]))
    total = n * f
    # All reshapes below are metadata-only on contiguous row-major data, so
    # the result is bit-identical to torch's x.view(N, -1).

    if total % _LANES == 0:
        rows = total // _LANES
        out2d = _copy_2d(x.reshape(rows, _LANES), total)
        return out2d.reshape(n, f)

    # Ragged sizes: pad the flat vector up to a lane multiple so the tiled,
    # pipelined path can be reused (never stages the whole array in VMEM),
    # then slice the pad back off.
    pad = (-total) % _LANES
    x1d = jnp.pad(x.reshape(total), (0, pad))
    rows = (total + pad) // _LANES
    out2d = _copy_2d(x1d.reshape(rows, _LANES), total)
    return out2d.reshape(rows * _LANES)[:total].reshape(n, f)


if __name__ == "__main__":
    key = jax.random.PRNGKey(0)
    # Small NCHW input consistent with a conv-style feature map.
    N, C, H, W = 2, 4, 16, 16
    x = jax.random.normal(key, (N, C, H, W), dtype=jnp.float32)

    out = flatten_layer(x)
    out = jax.block_until_ready(out)

    # Reference: exact semantics of torch's x.view(x.shape[0], -1).
    ref = x.reshape(N, -1)

    assert out.shape == (N, C * H * W), out.shape
    assert out.dtype == x.dtype, out.dtype
    assert jnp.array_equal(out, ref), "Pallas flatten mismatch vs reference"

    print("KERNEL_OK")
</pallas_src>

<mosaic_0001>
module attributes {stable_mosaic.version = 11 : i64} {
  func.func @_copy_kernel(%arg0: memref<16x128xf32, #tpu.memory_space<vmem>>, %arg1: memref<16x128xf32, #tpu.memory_space<vmem>>) attributes {dimension_semantics = [], scalar_prefetch = 0 : i64, scratch_operands = 0 : i64, tpu.core_type = #tpu.core_type<tc>} {
    %c0 = arith.constant 0 : index
    %c0_0 = arith.constant 0 : index
    %0 = vector.load %arg0[%c0, %c0_0] : memref<16x128xf32, #tpu.memory_space<vmem>>, vector<16x128xf32>
    %c0_1 = arith.constant 0 : index
    %c0_2 = arith.constant 0 : index
    %1 = vector.load %arg1[%c0_1, %c0_2] : memref<16x128xf32, #tpu.memory_space<vmem>>, vector<16x128xf32>
    tpu.vector_store %arg1[%c0_1, %c0_2], %0 {strides = array<i32>} : memref<16x128xf32, #tpu.memory_space<vmem>>, vector<16x128xf32>,
    return
  }
}

</mosaic_0001>

<bundles_post_ra>
// kernel: tpu_custom_call.1
= control target key start
LH: loop header
LB: loop body
LE: loop exit
PB: predicated region body
PF: predicated region fallthrough
CT: control target
= control target key end

     0   :  { %6 = vsyncpa [#allocation3], 0  ;;  %s124_s0 = inlined_call_operand.hbm [shape: f32[16,128], index: 0, kind: input, shape index: {}]   ;;  %s125_s1 = inlined_call_operand.hbm [shape: f32[16,128], index: 1, kind: output, shape index: {}]  }
   0x1   :  { %7 = vsyncpa [#allocation4], 0  ;;  %s12_s8 = sshll.u32 %s124_s0, 4  ;;  %s104_s9 = smov [#allocation2]   ;;  %s13_s8 = int_to_ptr.hbm [resolvable:$true] %s12_s8 }
   0x2   :  { %s14_s10 = sshll.u32 %s104_s9, 4  ;;  %s105_s11 = smov 128   ;;  %s15_s10 = int_to_ptr.vmem [resolvable:$true] %s14_s10 }
   0x3   :  { %s106_s12 = smov 8  }
   0x4   :  { %20 = dma.hbm_to_vmem [thread:$0]  %s13_s8, 256, %s15_s10, [#allocation3], %s105_s11, %s105_s11, %s106_s12  }
   0x5   :  { %100 = dma.done.wait [#allocation3], 256  }
   0x6   :  { %101 = vsyncadd [#allocation3], 4294967040  ;;  %s107_s13 = smov [#allocation5]   ;;  %s35_s17 = sshll.u32 %s125_s1, 4  ;;  %v25_v0 = vld [vmem:[#allocation2] sm:$0xff]  ;;  %v26_v1 = vld [vmem:[#allocation2 + $0x8] sm:$0xff]  ;;  %s36_s17 = int_to_ptr.hbm [resolvable:$true] %s35_s17 }
   0x7   :  { %s33_s14 = sshll.u32 %s107_s13, 4  ;;  %27 = vst [vmem:[#allocation5] sm:$0xff] %v25_v0  ;;  %s34_s14 = int_to_ptr.vmem [resolvable:$true] %s33_s14 }
   0x8   :  { %28 = vst [vmem:[#allocation5 + $0x8] sm:$0xff] %v26_v1 }
   0x9   :  { %41 = dma.vmem_to_hbm [thread:$0]  %s34_s14, 256, %s36_s17, [#allocation4], %s105_s11, %s105_s11, %s106_s12  }
   0xa   :  { %102 = dma.done.wait [#allocation4], 256  }
   0xb   :  { %103 = vsyncadd [#allocation4], 4294967040 }
   0xc   :  { %46 = vsyncpa [#allocation3], 1 }
   0xd   :  { %47 = vsyncpa [#allocation4], 1 }

</bundles_post_ra>
